<compile_context>
chip_gen: v5e
topology: v5e:2x2
jax: 0.10.0
libtpu: 0.0.40
codegen_flags: <defaults>
</compile_context>

<pallas_src>
import functools

import jax
import jax.numpy as jnp
from jax.experimental import pallas as pl
from jax.experimental.pallas import tpu as pltpu


def _round_up(x: int, m: int) -> int:
    return ((x + m - 1) // m) * m


# ---------------------------------------------------------------------------
# Last-token pooling (gather only; normalisation is fused into the loss kernel)
#   reps[b] = hidden[b, sum(mask[b]) - 1, :]
# ---------------------------------------------------------------------------
def pool_last_token(hidden, mask):
    B, S, H = hidden.shape
    lengths = jnp.sum(mask.astype(jnp.int32), axis=1) - 1
    # torch negative index -1 wraps to S-1 on fully-masked rows.
    lengths = jnp.where(lengths < 0, S - 1, lengths)
    return jnp.take_along_axis(hidden, lengths[:, None, None], axis=1)[:, 0, :]


# ---------------------------------------------------------------------------
# Fused contrastive-loss kernel:
#   scores = [q @ tgt^T | per-query negatives] / temperature
#   target[g] = g ; per-query CE = logsumexp(scores[g]) - scores[g, g]
# ---------------------------------------------------------------------------
def _loss_kernel(q_ref, tgt_ref, neg_ref, out_ref, *,
                 total_b: int, neg_ratio: int, row_tile: int,
                 temperature: float, normalize: bool, matmul_dtype):
    i = pl.program_id(0)
    B, R, bq = total_b, neg_ratio, row_tile
    inv_t = jnp.float32(1.0 / temperature)

    def l2norm(x):
        x32 = x.astype(jnp.float32)
        ss = jnp.sum(x32 * x32, axis=-1, keepdims=True)
        # == x / max(||x||, 1e-12)  (matches F.normalize eps); rsqrt -> EUP.
        return x32 * jax.lax.rsqrt(jnp.maximum(ss, jnp.float32(1e-24)))

    def prep(x):
        y = l2norm(x) if normalize else x.astype(jnp.float32)
        return y.astype(matmul_dtype)

    q = prep(q_ref[...])       # (bq,   H)   this tile's queries
    tgt = prep(tgt_ref[...])   # (B,    H)   resident positive block
    neg = prep(neg_ref[...])   # (bq*R, H)   this tile's own negatives only

    # A @ B^T on the MXU with f32 accumulation (no wrapper-side transpose).
    dn = (((1,), (1,)), ((), ()))
    pos = jax.lax.dot_general(q, tgt, dn,
                              preferred_element_type=jnp.float32) * inv_t   # (bq, B)
    negs = jax.lax.dot_general(q, neg, dn,
                               preferred_element_type=jnp.float32) * inv_t  # (bq, bq*R)

    # Positive ("target") logit: target[g] = g, so pick column i*bq + r of the
    # positive block only (no full-width masked reduce over the negatives).
    rp = jax.lax.broadcasted_iota(jnp.int32, (bq, B), 0) + i * bq
    cp = jax.lax.broadcasted_iota(jnp.int32, (bq, B), 1)
    picked = jnp.sum(jnp.where(cp == rp, pos, 0.0), axis=1, keepdims=True)   # (bq, 1)

    # Each local query row r owns negative columns r*R .. (r+1)*R - 1.
    rn = jax.lax.broadcasted_iota(jnp.int32, (bq, bq * R), 0)
    cn = jax.lax.broadcasted_iota(jnp.int32, (bq, bq * R), 1)
    own = (cn >= rn * R) & (cn < (rn + 1) * R)
    negs = jnp.where(own, negs, jnp.float32(-1e30))

    # Joint log-sum-exp over [positives | own negatives] without concatenating.
    m = jnp.maximum(jnp.max(pos, axis=1, keepdims=True),
                    jnp.max(negs, axis=1, keepdims=True))
    denom = (jnp.sum(jnp.exp(pos - m), axis=1, keepdims=True)
             + jnp.sum(jnp.exp(negs - m), axis=1, keepdims=True))
    lse = m + jnp.log(denom)                                                 # (bq, 1)

    # Query rows beyond B were zero-padded in the wrapper; mask them to 0.
    row_valid = (jax.lax.broadcasted_iota(jnp.int32, (bq, 1), 0) + i * bq) < B
    out_ref[...] = jnp.where(row_valid, lse - picked, 0.0)


def contrastive_loss(qry_reps, tgt_reps, neg_reps, *, temperature: float,
                     normalize: bool, matmul_dtype=jnp.bfloat16,
                     max_row_tile: int = 256):
    """Mean CE over scores = [q @ tgt^T | per-query negatives] / temperature."""
    B, H = qry_reps.shape
    assert neg_reps.shape[0] % B == 0
    R = neg_reps.shape[0] // B
    assert R >= 1

    # Query row tile: multiple of 8 sublanes, capped at 256 (prefer 128 on v5e).
    bq = min(_round_up(B, 8), max_row_tile)
    Bp = _round_up(B, bq)
    num_tiles = Bp // bq

    # Explicit zero padding -> block padding never feeds garbage into exp().
    q_pad = jnp.pad(qry_reps, ((0, Bp - B), (0, 0)))
    n_pad = jnp.pad(neg_reps, ((0, (Bp - B) * R), (0, 0)))

    kernel = functools.partial(
        _loss_kernel, total_b=B, neg_ratio=R, row_tile=bq,
        temperature=temperature, normalize=normalize, matmul_dtype=matmul_dtype)

    per_query = pl.pallas_call(
        kernel,
        out_shape=jax.ShapeDtypeStruct((Bp, 1), jnp.float32),
        grid=(num_tiles,),
        in_specs=[
            pl.BlockSpec((bq, H), lambda i: (i, 0)),        # query row tile
            pl.BlockSpec((B, H), lambda i: (0, 0)),         # resident positives
            pl.BlockSpec((bq * R, H), lambda i: (i, 0)),    # block-diag negatives
        ],
        out_specs=pl.BlockSpec((bq, 1), lambda i: (i, 0)),  # per-query CE terms
        compiler_params=pltpu.CompilerParams(
            dimension_semantics=("parallel",),              # megacore-friendly
            vmem_limit_bytes=48 * 1024 * 1024),
    )(q_pad, tgt_reps, n_pad)

    return jnp.sum(per_query) / jnp.float32(B)


# ---------------------------------------------------------------------------
# MMEBModel.forward (single-process: is_ddp == False, so no all-gather)
# ---------------------------------------------------------------------------
def mmeb_forward(qry_hidden, qry_mask, tgt_hidden, tgt_mask, neg_hidden, neg_mask,
                 *, normalize=True, temperature=0.02):
    # TODO(synk): the HF vision-language encoder itself has no Pallas equivalent
    # here; hidden states stand in for encoder(...).hidden_states[-1].
    qry_reps = pool_last_token(qry_hidden, qry_mask)
    tgt_reps = pool_last_token(tgt_hidden, tgt_mask)
    neg_reps = pool_last_token(neg_hidden, neg_mask)
    return contrastive_loss(qry_reps, tgt_reps, neg_reps,
                            temperature=temperature, normalize=normalize)


# ---------------------------------------------------------------------------
# Pure-JAX reference (same math as the PyTorch code path; same bf16-operand /
# f32-accumulation MXU convention as the kernel, since the real encoder runs
# in bf16).
# ---------------------------------------------------------------------------
def _ref_forward(qry_hidden, qry_mask, tgt_hidden, tgt_mask, neg_hidden, neg_mask,
                 *, normalize=True, temperature=0.02, matmul_dtype=jnp.bfloat16):
    def pool(h, m):
        lens = jnp.sum(m.astype(jnp.int32), axis=1) - 1
        lens = jnp.where(lens < 0, h.shape[1] - 1, lens)
        return h[jnp.arange(h.shape[0]), lens]

    def norm(x):
        x = x.astype(jnp.float32)
        return x / jnp.maximum(jnp.linalg.norm(x, axis=-1, keepdims=True), 1e-12)

    q = pool(qry_hidden, qry_mask)
    t = pool(tgt_hidden, tgt_mask)
    n = pool(neg_hidden, neg_mask)
    if normalize:
        q, t, n = norm(q), norm(t), norm(n)
    q, t, n = (x.astype(matmul_dtype) for x in (q, t, n))

    B = q.shape[0]
    R = n.shape[0] // B
    pos = jnp.dot(q, t.T, preferred_element_type=jnp.float32)                 # [B, B]
    neg = jnp.einsum('bh,brh->br', q, n.reshape(B, R, -1),
                     preferred_element_type=jnp.float32)                      # [B, R]
    scores = jnp.concatenate([pos, neg], axis=1) / temperature
    target = jnp.arange(B)
    lse = jax.scipy.special.logsumexp(scores, axis=1)
    return jnp.mean(lse - scores[jnp.arange(B), target])


if __name__ == "__main__":
    key = jax.random.PRNGKey(0)
    B, S, H, R = 4, 8, 128, 2  # batch, seq, hidden, negatives per query

    k1, k2, k3, k4, k5, k6 = jax.random.split(key, 6)

    def make_batch(kh, km, nb):
        hidden = jax.random.normal(kh, (nb, S, H), dtype=jnp.float32)
        lens = jax.random.randint(km, (nb, 1), minval=1, maxval=S + 1)
        mask = (jnp.arange(S)[None, :] < lens).astype(jnp.int32)
        return hidden, mask

    qry_hidden, qry_mask = make_batch(k1, k2, B)
    tgt_hidden, tgt_mask = make_batch(k3, k4, B)
    neg_hidden, neg_mask = make_batch(k5, k6, B * R)

    loss = mmeb_forward(qry_hidden, qry_mask, tgt_hidden, tgt_mask,
                        neg_hidden, neg_mask, normalize=True, temperature=0.02)
    loss = jax.block_until_ready(loss)

    ref = _ref_forward(qry_hidden, qry_mask, tgt_hidden, tgt_mask,
                       neg_hidden, neg_mask, normalize=True, temperature=0.02)
    assert bool(jnp.isfinite(loss)), loss
    assert jnp.allclose(loss, ref, rtol=2e-3, atol=2e-3), (loss, ref)

    print("KERNEL_OK")
</pallas_src>

<mosaic_0001>
module attributes {stable_mosaic.version = 11 : i64} {
  func.func @_loss_kernel(%arg0: i32, %arg1: memref<8x128xf32, #tpu.memory_space<vmem>>, %arg2: memref<4x128xf32, #tpu.memory_space<vmem>>, %arg3: memref<16x128xf32, #tpu.memory_space<vmem>>, %arg4: memref<8x1xf32, #tpu.memory_space<vmem>>) attributes {dimension_semantics = [#tpu.dimension_semantics<parallel>], iteration_bounds = array<i64: 1>, scalar_prefetch = 0 : i64, scratch_operands = 0 : i64, tpu.core_type = #tpu.core_type<tc>, window_params = [{transform_indices = @transform_0, window_bounds = array<i64: 8, 128>}, {pipeline_mode = #tpu.pipeline_mode<synchronous>, transform_indices = @transform_1, window_bounds = array<i64: 4, 128>}, {transform_indices = @transform_2, window_bounds = array<i64: 16, 128>}, {transform_indices = @transform_3, window_bounds = array<i64: 8, 1>}]} {
    %c0 = arith.constant 0 : index
    %c0_0 = arith.constant 0 : index
    %0 = vector.load %arg1[%c0, %c0_0] : memref<8x128xf32, #tpu.memory_space<vmem>>, vector<8x128xf32>
    %1 = arith.mulf %0, %0 : vector<8x128xf32>
    %cst = arith.constant dense<0.000000e+00> : vector<8xf32>
    %2 = vector.multi_reduction <add>, %1, %cst [1] : vector<8x128xf32> to vector<8xf32>
    %3 = vector.shape_cast %2 : vector<8xf32> to vector<8x1xf32>
    %cst_1 = arith.constant 1.000000e-24 : f32
    %4 = vector.broadcast %cst_1 : f32 to vector<8x1xf32>
    %5 = arith.maximumf %3, %4 : vector<8x1xf32>
    %6 = math.rsqrt %5 : vector<8x1xf32>
    %7 = vector.broadcast %6 : vector<8x1xf32> to vector<8x128xf32>
    %8 = arith.mulf %0, %7 : vector<8x128xf32>
    %9 = arith.truncf %8 : vector<8x128xf32> to vector<8x128xbf16>
    %c0_2 = arith.constant 0 : index
    %c0_3 = arith.constant 0 : index
    %10 = vector.load %arg2[%c0_2, %c0_3] : memref<4x128xf32, #tpu.memory_space<vmem>>, vector<4x128xf32>
    %11 = arith.mulf %10, %10 : vector<4x128xf32>
    %cst_4 = arith.constant dense<0.000000e+00> : vector<4xf32>
    %12 = vector.multi_reduction <add>, %11, %cst_4 [1] : vector<4x128xf32> to vector<4xf32>
    %13 = vector.shape_cast %12 : vector<4xf32> to vector<4x1xf32>
    %cst_5 = arith.constant 1.000000e-24 : f32
    %14 = vector.broadcast %cst_5 : f32 to vector<4x1xf32>
    %15 = arith.maximumf %13, %14 : vector<4x1xf32>
    %16 = math.rsqrt %15 : vector<4x1xf32>
    %17 = vector.broadcast %16 : vector<4x1xf32> to vector<4x128xf32>
    %18 = arith.mulf %10, %17 : vector<4x128xf32>
    %19 = arith.truncf %18 : vector<4x128xf32> to vector<4x128xbf16>
    %c0_6 = arith.constant 0 : index
    %c0_7 = arith.constant 0 : index
    %20 = vector.load %arg3[%c0_6, %c0_7] : memref<16x128xf32, #tpu.memory_space<vmem>>, vector<16x128xf32>
    %21 = arith.mulf %20, %20 : vector<16x128xf32>
    %cst_8 = arith.constant dense<0.000000e+00> : vector<16xf32>
    %22 = vector.multi_reduction <add>, %21, %cst_8 [1] : vector<16x128xf32> to vector<16xf32>
    %23 = vector.shape_cast %22 : vector<16xf32> to vector<16x1xf32>
    %cst_9 = arith.constant 1.000000e-24 : f32
    %24 = vector.broadcast %cst_9 : f32 to vector<16x1xf32>
    %25 = arith.maximumf %23, %24 : vector<16x1xf32>
    %26 = math.rsqrt %25 : vector<16x1xf32>
    %27 = vector.broadcast %26 : vector<16x1xf32> to vector<16x128xf32>
    %28 = arith.mulf %20, %27 : vector<16x128xf32>
    %29 = arith.truncf %28 : vector<16x128xf32> to vector<16x128xbf16>
    %cst_10 = arith.constant dense<0.000000e+00> : vector<8x4xf32>
    %30 = tpu.matmul %9, %19, %cst_10 {dimension_numbers = #tpu.dot_dimension_numbers<[1], [1], [0], [0], [0, 0, 1, 0], [], []>} : vector<8x128xbf16>, vector<4x128xbf16>, vector<8x4xf32> -> vector<8x4xf32>
    %cst_11 = arith.constant 5.000000e+01 : f32
    %31 = vector.broadcast %cst_11 : f32 to vector<8x4xf32>
    %32 = arith.mulf %30, %31 : vector<8x4xf32>
    %cst_12 = arith.constant dense<0.000000e+00> : vector<8x16xf32>
    %33 = tpu.matmul %9, %29, %cst_12 {dimension_numbers = #tpu.dot_dimension_numbers<[1], [1], [0], [0], [0, 0, 1, 0], [], []>} : vector<8x128xbf16>, vector<16x128xbf16>, vector<8x16xf32> -> vector<8x16xf32>
    %cst_13 = arith.constant 5.000000e+01 : f32
    %34 = vector.broadcast %cst_13 : f32 to vector<8x16xf32>
    %35 = arith.mulf %33, %34 : vector<8x16xf32>
    %36 = tpu.iota {dimensions = array<i32: 0>} : vector<8x4xi32>
    %c8_i32 = arith.constant 8 : i32
    %37 = arith.muli %arg0, %c8_i32 : i32
    %38 = vector.broadcast %37 : i32 to vector<8x4xi32>
    %39 = arith.addi %36, %38 : vector<8x4xi32>
    %40 = tpu.iota {dimensions = array<i32: 1>} : vector<8x4xi32>
    %41 = arith.cmpi eq, %40, %39 : vector<8x4xi32>
    %cst_14 = arith.constant 0.000000e+00 : f32
    %42 = vector.broadcast %cst_14 : f32 to vector<8x4xf32>
    %43 = arith.select %41, %32, %42 : vector<8x4xi1>, vector<8x4xf32>
    %cst_15 = arith.constant dense<0.000000e+00> : vector<8xf32>
    %44 = vector.multi_reduction <add>, %43, %cst_15 [1] : vector<8x4xf32> to vector<8xf32>
    %45 = vector.shape_cast %44 : vector<8xf32> to vector<8x1xf32>
    %46 = tpu.iota {dimensions = array<i32: 0>} : vector<8x16xi32>
    %47 = tpu.iota {dimensions = array<i32: 1>} : vector<8x16xi32>
    %c2_i32 = arith.constant 2 : i32
    %48 = vector.broadcast %c2_i32 : i32 to vector<8x16xi32>
    %49 = arith.muli %46, %48 : vector<8x16xi32>
    %50 = arith.cmpi sge, %47, %49 : vector<8x16xi32>
    %c1_i32 = arith.constant 1 : i32
    %51 = vector.broadcast %c1_i32 : i32 to vector<8x16xi32>
    %52 = arith.addi %46, %51 : vector<8x16xi32>
    %c2_i32_16 = arith.constant 2 : i32
    %53 = vector.broadcast %c2_i32_16 : i32 to vector<8x16xi32>
    %54 = arith.muli %52, %53 : vector<8x16xi32>
    %55 = arith.cmpi slt, %47, %54 : vector<8x16xi32>
    %56 = arith.andi %50, %55 : vector<8x16xi1>
    %cst_17 = arith.constant -1.000000e+30 : f32
    %57 = vector.broadcast %cst_17 : f32 to vector<8x16xf32>
    %58 = arith.select %56, %35, %57 : vector<8x16xi1>, vector<8x16xf32>
    %cst_18 = arith.constant dense<0xFF800000> : vector<8xf32>
    %59 = vector.multi_reduction <maximumf>, %32, %cst_18 [1] : vector<8x4xf32> to vector<8xf32>
    %60 = vector.shape_cast %59 : vector<8xf32> to vector<8x1xf32>
    %cst_19 = arith.constant dense<0xFF800000> : vector<8xf32>
    %61 = vector.multi_reduction <maximumf>, %58, %cst_19 [1] : vector<8x16xf32> to vector<8xf32>
    %62 = vector.shape_cast %61 : vector<8xf32> to vector<8x1xf32>
    %63 = arith.maximumf %60, %62 : vector<8x1xf32>
    %64 = vector.broadcast %63 : vector<8x1xf32> to vector<8x4xf32>
    %65 = arith.subf %32, %64 : vector<8x4xf32>
    %66 = math.exp %65 : vector<8x4xf32>
    %cst_20 = arith.constant dense<0.000000e+00> : vector<8xf32>
    %67 = vector.multi_reduction <add>, %66, %cst_20 [1] : vector<8x4xf32> to vector<8xf32>
    %68 = vector.shape_cast %67 : vector<8xf32> to vector<8x1xf32>
    %69 = vector.broadcast %63 : vector<8x1xf32> to vector<8x16xf32>
    %70 = arith.subf %58, %69 : vector<8x16xf32>
    %71 = math.exp %70 : vector<8x16xf32>
    %cst_21 = arith.constant dense<0.000000e+00> : vector<8xf32>
    %72 = vector.multi_reduction <add>, %71, %cst_21 [1] : vector<8x16xf32> to vector<8xf32>
    %73 = vector.shape_cast %72 : vector<8xf32> to vector<8x1xf32>
    %74 = arith.addf %68, %73 : vector<8x1xf32>
    %75 = math.log %74 : vector<8x1xf32>
    %76 = arith.addf %63, %75 : vector<8x1xf32>
    %77 = tpu.iota {dimensions = array<i32: 0>} : vector<8x1xi32>
    %c8_i32_22 = arith.constant 8 : i32
    %78 = arith.muli %arg0, %c8_i32_22 : i32
    %79 = vector.broadcast %78 : i32 to vector<8x1xi32>
    %80 = arith.addi %77, %79 : vector<8x1xi32>
    %c4_i32 = arith.constant 4 : i32
    %81 = vector.broadcast %c4_i32 : i32 to vector<8x1xi32>
    %82 = arith.cmpi slt, %80, %81 : vector<8x1xi32>
    %83 = arith.subf %76, %45 : vector<8x1xf32>
    %cst_23 = arith.constant 0.000000e+00 : f32
    %84 = vector.broadcast %cst_23 : f32 to vector<8x1xf32>
    %85 = arith.select %82, %83, %84 : vector<8x1xi1>, vector<8x1xf32>
    %c0_24 = arith.constant 0 : index
    %c0_25 = arith.constant 0 : index
    %86 = vector.load %arg4[%c0_24, %c0_25] : memref<8x1xf32, #tpu.memory_space<vmem>>, vector<8x1xf32>
    tpu.vector_store %arg4[%c0_24, %c0_25], %85 {strides = array<i32>} : memref<8x1xf32, #tpu.memory_space<vmem>>, vector<8x1xf32>,
    return
  }
  func.func @transform_0(%arg0: i32) -> (i32, i32) {
    %c0_i32 = arith.constant 0 : i32
    %c0_i32_0 = arith.constant 0 : i32
    return %arg0, %c0_i32 : i32, i32
  }
  func.func @transform_1(%arg0: i32) -> (i32, i32) {
    %c0_i32 = arith.constant 0 : i32
    %c0_i32_0 = arith.constant 0 : i32
    %c0_i32_1 = arith.constant 0 : i32
    return %c0_i32, %c0_i32_0 : i32, i32
  }
  func.func @transform_2(%arg0: i32) -> (i32, i32) {
    %c0_i32 = arith.constant 0 : i32
    %c0_i32_0 = arith.constant 0 : i32
    return %arg0, %c0_i32 : i32, i32
  }
  func.func @transform_3(%arg0: i32) -> (i32, i32) {
    %c0_i32 = arith.constant 0 : i32
    %c0_i32_0 = arith.constant 0 : i32
    return %arg0, %c0_i32 : i32, i32
  }
}

</mosaic_0001>

<bundles_post_ra>
// kernel: tpu_custom_call.1
= control target key start
LH: loop header
LB: loop body
LE: loop exit
PB: predicated region body
PF: predicated region fallthrough
CT: control target
= control target key end

     0   :  { %8 = vsyncpa [#allocation3], 0  ;;  %s357_s0 = inlined_call_operand.hbm [shape: f32[8,128], index: 0, kind: input, shape index: {}]   ;;  %s358_s1 = inlined_call_operand.hbm [shape: f32[4,128], index: 1, kind: input, shape index: {}]   ;;  %s359_s2 = inlined_call_operand.hbm [shape: f32[16,128], index: 2, kind: input, shape index: {}]   ;;  %s360_s3 = inlined_call_operand.vmem [shape: f32[8,1], index: 3, kind: output, shape index: {}]  }
   0x1   :  { %9 = vsyncpa [#allocation5], 0  ;;  %s26_s14 = sshll.u32 %s358_s1, 4  ;;  %s305_s15 = smov [#allocation4]   ;;  %s27_s14 = int_to_ptr.hbm [resolvable:$true] %s26_s14 }
   0x2   :  { %s28_s16 = sshll.u32 %s305_s15, 4  ;;  %s15_s19 = sshll.u32 %s357_s0, 4  ;;  %s29_s16 = int_to_ptr.vmem [resolvable:$true] %s28_s16  ;;  %s16_s19 = int_to_ptr.hbm [resolvable:$true] %s15_s19 }
   0x3   :  { %31 = dma.hbm_to_vmem [thread:$0]  %s27_s14, 64, %s29_s16, [#allocation5]  }
   0x4   :  { %s306_s20 = smov [#allocation2]   ;;  %s36_s24 = sshll.u32 %s359_s2, 4  ;;  %s37_s24 = int_to_ptr.hbm [resolvable:$true] %s36_s24 }
   0x5   :  { %s17_s21 = sshll.u32 %s306_s20, 4  ;;  %s307_s1 = smov [#allocation6]   ;;  %s18_s21 = int_to_ptr.vmem [resolvable:$true] %s17_s21 }
   0x6   :  { %20 = dma.hbm_to_vmem [thread:$0]  %s16_s19, 128, %s18_s21, [#allocation3]  }
   0x7   :  { %s38_s25 = sshll.u32 %s307_s1, 4  ;;  %s308_s26 = smov 128   ;;  %s39_s25 = int_to_ptr.vmem [resolvable:$true] %s38_s25 }
   0x8   :  { %s309_s27 = smov 8  }
   0x9   :  { %44 = dma.hbm_to_vmem [thread:$0]  %s37_s24, 256, %s39_s25, [#allocation5], %s308_s26, %s308_s26, %s309_s27  }
   0xa   :  { %301 = dma.done.wait [#allocation3], 128  }
   0xb   :  { %302 = vsyncadd [#allocation3], 4294967168 }
   0xc   :  { %303 = dma.done.wait [#allocation5], 320  }
   0xd   :  { %304 = vsyncadd [#allocation5], 4294966976  ;;  %v339_v0 = vld [vmem:[#allocation6] sm:$0xff]  ;;  %v75_v1 = vld [vmem:[#allocation4] sm:$0xf]  ;;  %vm77_vm0 = vcmask 1043456   ;;  %v155_v52 = vlaneseq }
   0xe   :  { %v96_v2 = vmul.f32 %v339_v0, %v339_v0  ;;  %v76_v3 = vmul.f32 %v75_v1, %v75_v1  ;;  %v95_v5 = vld [vmem:[#allocation6 + $0x8] sm:$0xff]  ;;  %v343_v6 = vld [vmem:[#allocation2] sm:$0xff]  ;;  %vm164_vm13 = vcmask 31744  }
   0xf   :  { %v97_v7 = vmul.f32 %v95_v5, %v95_v5  ;;  %v59_v8 = vmul.f32 %v343_v6, %v343_v6  ;;  %v156_v53 = vshrl.u32 %v155_v52, 7  ;;  %v161_v59 = vand.u32 127, %v155_v52 }
  0x10   :  { %98 = vadd.xlane.f32.xlu0 %v96_v2  ;;  %v78_v4 = vsel %vm77_vm0, %v76_v3, 0.0 }
  0x11   :  { %79 = vadd.xlane.f32.xlu1 %v78_v4  ;;  %v170_v54 = vadd.s32 1, %v156_v53  ;;  %v168_v55 = vmul.u32 2, %v156_v53 }
  0x13   :  { %v171_v56 = vmul.u32 2, %v170_v54  ;;  %vm169_vm14 = vcmp.ge.s32.totalorder %v161_v59, %v168_v55 }
  0x15   :  { %vm172_vm15 = vcmp.lt.s32.totalorder %v161_v59, %v171_v56 }
  0x16   :  { %vm173_vm0 = vmand %vm169_vm14, %vm172_vm15 }
  0x18   :  { %100 = vadd.xlane.f32.xlu0 %v97_v7 }
  0x19   :  { %60 = vadd.xlane.f32.xlu1 %v59_v8 }
  0x83   :  { %v99_v9 = vpop.xlane.xlu0 %98 }
  0x84   :  { %v102_v10 = vmax.f32 %v99_v9, 1e-24  ;;  %v80_v11 = vpop.xlane.xlu1 %79 }
  0x85   :  { %v81_v12 = vmax.f32 %v80_v11, 1e-24 }
  0x86   :  { %215 = vrsqrt.f32 %v102_v10  ;;  %vm110_vm5 = vweird.f32 %v102_v10 }
  0x87   :  { %217 = vrsqrt.f32 %v81_v12  ;;  %vm88_vm2 = vweird.f32 %v81_v12 }
  0x8b   :  { %v101_v13 = vpop.xlane.xlu0 %100 }
  0x8c   :  { %v216_v14 = vpop.eup %215  ;;  %v103_v15 = vmax.f32 %v101_v13, 1e-24  ;;  %v61_v16 = vpop.xlane.xlu1 %60 }
  0x8d   :  { %v218_v17 = vpop.eup %217  ;;  %v105_v18 = vmul.f32 %v216_v14, %v102_v10  ;;  %v62_v19 = vmax.f32 %v61_v16, 1e-24  ;;  %vm111_vm4 = vweird.f32 %v216_v14 }
  0x8e   :  { %v83_v20 = vmul.f32 %v218_v17, %v81_v12  ;;  %219 = vrsqrt.f32 %v103_v15  ;;  %vm89_vm1 = vweird.f32 %v218_v17  ;;  %vm112_vm7 = vmor %vm110_vm5, %vm111_vm4  ;;  %vm120_vm9 = vweird.f32 %v103_v15 }
  0x8f   :  { %v106_v21 = vmul.f32 %v216_v14, %v105_v18  ;;  %221 = vrsqrt.f32 %v62_v19  ;;  %vm90_vm3 = vmor %vm88_vm2, %vm89_vm1  ;;  %vm69_vm10 = vweird.f32 %v62_v19  ;;  %vm178_vm1 = vcmask 130048  }
  0x90   :  { %v84_v22 = vmul.f32 %v218_v17, %v83_v20  ;;  %vm162_vm2 = vcmp.eq.s32.totalorder %v161_v59, %v156_v53  ;;  %vm202_vm4 = vcmask 7168  }
  0x91   :  { %v107_v23 = vmul.f32 0.5, %v106_v21 }
  0x92   :  { %v85_v24 = vmul.f32 0.5, %v84_v22 }
  0x93   :  { %v108_v28 = vsub.f32 1.5, %v107_v23 }
  0x94   :  { %v220_v25 = vpop.eup %219  ;;  %v86_v26 = vsub.f32 1.5, %v85_v24 }
  0x95   :  { %v222_v27 = vpop.eup %221  ;;  %v115_v29 = vmul.f32 %v220_v25, %v103_v15  ;;  %v109_v37 = vmul.f32 %v216_v14, %v108_v28  ;;  %vm121_vm6 = vweird.f32 %v220_v25 }
  0x96   :  { %v64_v30 = vmul.f32 %v222_v27, %v62_v19  ;;  %v87_v31 = vmul.f32 %v218_v17, %v86_v26  ;;  %vm70_vm8 = vweird.f32 %v222_v27  ;;  %vm122_vm11 = vmor %vm120_vm9, %vm121_vm6 }
  0x97   :  { %v116_v32 = vmul.f32 %v220_v25, %v115_v29  ;;  %v113_v42 = vsel %vm112_vm7, %v216_v14, %v109_v37  ;;  %vm71_vm12 = vmor %vm69_vm10, %vm70_vm8 }
  0x98   :  { %v65_v33 = vmul.f32 %v222_v27, %v64_v30  ;;  %v91_v34 = vsel %vm90_vm3, %v218_v17, %v87_v31  ;;  %v124_v46 = vmul.f32 %v113_v42, %v339_v0  ;;  %vm199_vm3 = vcmp.lt.s32.totalorder %v156_v53, 4 }
  0x99   :  { %v117_v35 = vmul.f32 0.5, %v116_v32  ;;  %v92_v36 = vmul.f32 %v91_v34, %v75_v1 }
  0x9a   :  { %v66_v38 = vmul.f32 0.5, %v65_v33 }
  0x9b   :  { %v118_v39 = vsub.f32 1.5, %v117_v35  ;;  %v93_v40 = vpack.c.bf16 %v92_v36, %v92_v36 }
  0x9c   :  { %v67_v41 = vsub.f32 1.5, %v66_v38 }
  0x9d   :  { %134 = vmatpush.bf16.xpose.msra.mxu0 %v93_v40  ;;  %v119_v43 = vmul.f32 %v220_v25, %v118_v39 }
  0x9e   :  { %v68_v44 = vmul.f32 %v222_v27, %v67_v41 }
  0x9f   :  { %v123_v45 = vsel %vm122_vm11, %v220_v25, %v119_v43 }
  0xa0   :  { %v125_v47 = vmul.f32 %v123_v45, %v95_v5  ;;  %v72_v48 = vsel %vm71_vm12, %v222_v27, %v68_v44 }
  0xa1   :  { %v73_v49 = vmul.f32 %v72_v48, %v343_v6 }
  0xa2   :  { %v126_v50 = vpack.c.bf16 %v125_v47, %v124_v46 }
  0xa3   :  { %v74_v51 = vpack.c.bf16 %v73_v49, %v73_v49 }
  0xa4   :  { %148 = vmatpush.bf16.xpose.msra.mxu1 %v126_v50 }
  0xa5   :  { %135 = vmatmul.bf16.vlgmr.msra.gmra.mxu0 %v74_v51 }
  0xab   :  { %149 = vmatmul.bf16.vlgmr.msra.gmra.mxu1 %v74_v51 }
 0x122   :  { %v136_v57 = vpop.f32.mrf.mxu0 }
 0x123   :  { %v140_v58 = vmul.f32 50.0, %v136_v57 }
 0x125   :  { %v175_v60 = vsel %vm164_vm13, %v140_v58, -inf  ;;  %v163_v3 = vsel %vm162_vm2, %v140_v58, 0.0 }
 0x126   :  { %176 = vmax.xlane.f32.xlu2 %v175_v60  ;;  %v165_v4 = vsel %vm164_vm13, %v163_v3, 0.0 }
 0x128   :  { %v150_v61 = vpop.f32.mrf.mxu1 }
 0x129   :  { %v154_v62 = vmul.f32 50.0, %v150_v61 }
 0x12a   :  { %v138_v63 = vpop.f32.mrf.mxu0 }
 0x12b   :  { %v174_v0 = vsel %vm173_vm0, %v154_v62, -1e+30 }
 0x12c   :  { %v179_v1 = vsel %vm178_vm1, %v174_v0, -inf }
 0x12e   :  { %180 = vmax.xlane.f32.xlu2 %v179_v1 }
 0x130   :  { %v152_v2 = vpop.f32.mrf.mxu1 }
 0x136   :  { %166 = vadd.xlane.f32.xlu2 %v165_v4 }
 0x199   :  { %v177_v5 = vpop.xlane.xlu2 %176 }
 0x1a1   :  { %v181_v6 = vpop.xlane.xlu2 %180 }
 0x1a2   :  { %v182_v7 = vmax.f32 %v177_v5, %v181_v6 }
 0x1a4   :  { %v183_v8 = vsub.f32 %v140_v58, %v182_v7  ;;  %v189_v9 = vsub.f32 %v174_v0, %v182_v7 }
 0x1a6   :  { %v184_v10 = vmul.f32 1.442695, %v183_v8  ;;  %v190_v11 = vmul.f32 1.442695, %v189_v9 }
 0x1a8   :  { %223 = vpow2.f32 %v184_v10 }
 0x1a9   :  { %225 = vpow2.f32 %v190_v11  ;;  %v167_v22 = vpop.xlane.xlu2 %166 }
 0x1ae   :  { %v224_v12 = vpop.eup %223 }
 0x1af   :  { %v226_v13 = vpop.eup %225  ;;  %v186_v14 = vsel %vm164_vm13, %v224_v12, 0.0 }
 0x1b0   :  { %v192_v15 = vsel %vm178_vm1, %v226_v13, 0.0  ;;  %187 = vadd.xlane.f32.xlu0 %v186_v14 }
 0x1b1   :  { %193 = vadd.xlane.f32.xlu1 %v192_v15 }
 0x223   :  { %v188_v16 = vpop.xlane.xlu0 %187 }
 0x224   :  { %v194_v17 = vpop.xlane.xlu1 %193 }
 0x225   :  { %v195_v18 = vadd.f32 %v194_v17, %v188_v16 }
 0x227   :  { %227 = vlog2.f32 %v195_v18 }
 0x22d   :  { %v228_v19 = vpop.eup %227 }
 0x22e   :  { %v197_v20 = vmul.f32 0.6931472, %v228_v19 }
 0x230   :  { %v198_v21 = vadd.f32 %v197_v20, %v182_v7 }
 0x232   :  { %v200_v23 = vsub.f32 %v198_v21, %v167_v22 }
 0x234   :  { %v201_v24 = vsel %vm199_vm3, %v200_v23, 0.0 }
 0x235   :  { %203 = vst.msk [vmem:[%s360_s3] sm:$0xff] %vm202_vm4, %v201_v24 }
 0x236   :  { %208 = vsyncpa [#allocation3], 1 }
 0x237   :  { %209 = vsyncpa [#allocation5], 1 }

</bundles_post_ra>
